<compile_context>
chip_gen: v7x
topology: tpu7x:2x2x1
jax: 0.10.0
libtpu: 0.0.40
codegen_flags: <defaults>
</compile_context>

<pallas_src>
import math
from functools import partial

import jax
import jax.numpy as jnp
from jax import lax
from jax.experimental import pallas as pl
from jax.experimental.pallas import tpu as pltpu


# ----------------------------------------------------------------------------
# Kernel 1: fused Q/K/V input projections (full-width matmuls, per-head layout)
# ----------------------------------------------------------------------------
def _proj_kernel(xq_ref, xk_ref, xv_ref,
                 wq_ref, wk_ref, wv_ref,
                 bq_ref, bk_ref, bv_ref,
                 qo_ref, ko_ref, vo_ref,
                 *, num_heads: int, d_k: int):
    def project(x_ref, w_ref, b_ref, o_ref):
        # Full lane-width (TN, D) x (D, D) matmul -> much better MXU
        # utilization than per-head (D, d_k) projections.
        y = jnp.dot(x_ref[0], w_ref[...],
                    preferred_element_type=jnp.float32) + b_ref[...]
        y = y.astype(o_ref.dtype)                        # bf16 for attention
        for h in range(num_heads):                       # static, H is small
            o_ref[0, h] = y[:, h * d_k:(h + 1) * d_k]    # (TN, d_k) per head

    project(xq_ref, wq_ref, bq_ref, qo_ref)
    project(xk_ref, wk_ref, bk_ref, ko_ref)
    project(xv_ref, wv_ref, bv_ref, vo_ref)


# ----------------------------------------------------------------------------
# Kernel 2: per-head attention + fused head-concat / output projection
# ----------------------------------------------------------------------------
def _attn_kernel(q_ref, k_ref, v_ref, wo_ref, bo_ref, out_ref, acc_ref):
    h = pl.program_id(2)

    @pl.when(h == 0)
    def _():
        acc_ref[...] = jnp.zeros_like(acc_ref)

    q = q_ref[0, 0]                                   # (TQ, d_k) bf16 (scaled)
    k = k_ref[0, 0]                                   # (N,  d_k) bf16
    v = v_ref[0, 0]                                   # (N,  d_k) bf16

    # NT contraction on the MXU -- no materialized transpose of k.
    s = lax.dot_general(q, k, (((1,), (1,)), ((), ())),
                        preferred_element_type=jnp.float32)        # (TQ, N)

    # Numerically stable softmax with DEFERRED normalization: the reciprocal
    # multiply is applied to the (TQ, d_k) PV result, not the (TQ, N) probs.
    s = s - jnp.max(s, axis=-1, keepdims=True)
    p = jnp.exp(s)
    row_sum = jnp.sum(p, axis=-1, keepdims=True)                   # (TQ, 1)

    x = jnp.dot(p.astype(jnp.bfloat16), v,
                preferred_element_type=jnp.float32)                # (TQ, d_k)
    x = x * pl.reciprocal(row_sum, approx=True)                    # EUP slot

    # Fused head-concat + output projection: concat_h(x_h) @ Wo
    #   == sum_h x_h @ Wo[h*d_k:(h+1)*d_k, :]
    acc_ref[...] += jnp.dot(x.astype(jnp.bfloat16), wo_ref[0],
                            preferred_element_type=jnp.float32)    # (TQ, D)

    @pl.when(h == pl.num_programs(2) - 1)
    def _():
        out_ref[0] = (acc_ref[...] + bo_ref[...]).astype(out_ref.dtype)


# ----------------------------------------------------------------------------
# Wrapper
# ----------------------------------------------------------------------------
def _pick_tile(n: int, max_tile: int = 256) -> int:
    """Largest tile <= max_tile that divides n (all candidates are 8-aligned)."""
    if n <= max_tile:
        return n
    for t in (256, 128, 64, 32, 16, 8):
        if t <= max_tile and n % t == 0:
            return t
    return n


def multi_headed_attention(query, key, value, params, *, num_heads: int):
    """params: dict with wq, bq, wk, bk, wv, bv, wo, bo.
    Weights are stored PyTorch-style (out, in); biases are (D,)."""
    B, N, D = query.shape
    assert D % num_heads == 0
    d_k = D // num_heads
    scale = 1.0 / math.sqrt(d_k)

    # --- Weight prep (wrapper side, done once) ------------------------------
    # (in, out) layout; 1/sqrt(d_k) folded into Wq / bq.
    wq = (params["wq"].T * scale).astype(jnp.bfloat16)          # (D, D)
    wk = params["wk"].T.astype(jnp.bfloat16)                    # (D, D)
    wv = params["wv"].T.astype(jnp.bfloat16)                    # (D, D)
    bq = (params["bq"] * scale).reshape(1, D).astype(jnp.float32)
    bk = params["bk"].reshape(1, D).astype(jnp.float32)
    bv = params["bv"].reshape(1, D).astype(jnp.float32)
    # Output projection -> (H, d_k, D) so head-concat becomes a sum over heads.
    wo = params["wo"].T.reshape(num_heads, d_k, D).astype(jnp.bfloat16)
    bo = params["bo"].reshape(1, D).astype(jnp.float32)

    # bf16 activations: halves HBM traffic and VMEM residency.
    q_in = query.astype(jnp.bfloat16)
    k_in = key.astype(jnp.bfloat16)
    v_in = value.astype(jnp.bfloat16)

    compiler_params = pltpu.CompilerParams(
        dimension_semantics=("parallel", "parallel"),
        vmem_limit_bytes=32 * 1024 * 1024)

    # ---------------- Kernel 1: projections --------------------------------
    tn = _pick_tile(N)
    n_n = N // tn

    x_spec = pl.BlockSpec((1, tn, D), lambda b, i: (b, i, 0))
    w_spec = pl.BlockSpec((D, D), lambda b, i: (0, 0))
    b_spec = pl.BlockSpec((1, D), lambda b, i: (0, 0))
    po_spec = pl.BlockSpec((1, num_heads, tn, d_k), lambda b, i: (b, 0, i, 0))

    proj_cost = pl.CostEstimate(
        flops=int(3 * 2 * B * N * D * D),
        transcendentals=0,
        bytes_accessed=int(6 * B * N * D * 2 + 3 * D * D * 2 + 3 * D * 4))

    qp, kp, vp = pl.pallas_call(
        partial(_proj_kernel, num_heads=num_heads, d_k=d_k),
        out_shape=[jax.ShapeDtypeStruct((B, num_heads, N, d_k), jnp.bfloat16)] * 3,
        grid_spec=pltpu.PrefetchScalarGridSpec(
            num_scalar_prefetch=0,
            grid=(B, n_n),
            in_specs=[x_spec, x_spec, x_spec,
                      w_spec, w_spec, w_spec,
                      b_spec, b_spec, b_spec],
            out_specs=[po_spec, po_spec, po_spec]),
        compiler_params=compiler_params,
        cost_estimate=proj_cost,
    )(q_in, k_in, v_in, wq, wk, wv, bq, bk, bv)

    # ---------------- Kernel 2: attention + output projection ---------------
    tq = _pick_tile(N)
    n_q = N // tq

    q_spec = pl.BlockSpec((1, 1, tq, d_k), lambda b, i, h: (b, h, i, 0))
    kv_spec = pl.BlockSpec((1, 1, N, d_k), lambda b, i, h: (b, h, 0, 0))
    wo_spec = pl.BlockSpec((1, d_k, D), lambda b, i, h: (h, 0, 0))
    bo_spec = pl.BlockSpec((1, D), lambda b, i, h: (0, 0))
    out_spec = pl.BlockSpec((1, tq, D), lambda b, i, h: (b, i, 0))

    attn_cost = pl.CostEstimate(
        flops=int(2 * B * num_heads * (2 * N * N * d_k + N * d_k * D)),
        transcendentals=int(B * num_heads * N * N),
        bytes_accessed=int(3 * B * N * D * 2 + B * N * D * 4
                           + D * D * 2 + D * 4))

    out = pl.pallas_call(
        _attn_kernel,
        out_shape=jax.ShapeDtypeStruct((B, N, D), query.dtype),
        grid_spec=pltpu.PrefetchScalarGridSpec(
            num_scalar_prefetch=0,
            grid=(B, n_q, num_heads),
            in_specs=[q_spec, kv_spec, kv_spec, wo_spec, bo_spec],
            out_specs=out_spec,
            scratch_shapes=[pltpu.VMEM((tq, D), jnp.float32)]),
        compiler_params=pltpu.CompilerParams(
            dimension_semantics=("parallel", "parallel", "arbitrary"),
            vmem_limit_bytes=32 * 1024 * 1024),
        cost_estimate=attn_cost,
    )(qp, kp, vp, wo, bo)

    return out


# ----------------------------------------------------------------------------
# Reference / self-test
# ----------------------------------------------------------------------------
def _reference(query, key, value, params, num_heads):
    """Plain-JAX fp32 reference (dropout disabled) for correctness checking."""
    B, N, D = query.shape
    d_k = D // num_heads

    def lin(x, w, b):
        return x @ w.T + b

    q = lin(query, params["wq"], params["bq"]).reshape(B, N, num_heads, d_k).transpose(0, 2, 1, 3)
    k = lin(key, params["wk"], params["bk"]).reshape(B, N, num_heads, d_k).transpose(0, 2, 1, 3)
    v = lin(value, params["wv"], params["bv"]).reshape(B, N, num_heads, d_k).transpose(0, 2, 1, 3)

    scores = jnp.einsum("bhnd,bhmd->bhnm", q, k) / math.sqrt(d_k)
    p = jax.nn.softmax(scores, axis=-1)
    x = jnp.einsum("bhnm,bhmd->bhnd", p, v)
    x = x.transpose(0, 2, 1, 3).reshape(B, N, D)
    return lin(x, params["wo"], params["bo"])


def _init_params(key, d_model):
    """Deterministic init mimicking nn.Linear default (uniform +-1/sqrt(fan_in))."""
    bound = 1.0 / math.sqrt(d_model)
    names = ["wq", "bq", "wk", "bk", "wv", "bv", "wo", "bo"]
    keys = jax.random.split(key, len(names))
    params = {}
    for n, k in zip(names, keys):
        shape = (d_model, d_model) if n.startswith("w") else (d_model,)
        params[n] = jax.random.uniform(k, shape, jnp.float32, -bound, bound)
    return params


if __name__ == "__main__":
    B, N, D, H = 2, 8, 32, 4  # batch, seq, d_model, heads  (d_k = 8)

    root = jax.random.PRNGKey(0)
    k_q, k_k, k_v, k_p = jax.random.split(root, 4)
    query = jax.random.normal(k_q, (B, N, D), jnp.float32)
    key = jax.random.normal(k_k, (B, N, D), jnp.float32)
    value = jax.random.normal(k_v, (B, N, D), jnp.float32)
    params = _init_params(k_p, D)

    out = multi_headed_attention(query, key, value, params, num_heads=H)
    out = jax.block_until_ready(out)

    ref = _reference(query, key, value, params, H)
    assert out.shape == (B, N, D)
    # bf16 MXU operands + approx reciprocal -> looser tolerance than pure fp32.
    assert jnp.allclose(out, ref, atol=5e-2, rtol=5e-2), "mismatch vs reference"

    print("KERNEL_OK")
</pallas_src>

<mosaic_0001>
module attributes {stable_mosaic.version = 11 : i64} {
  func.func @_proj_kernel(%arg0: i32, %arg1: i32, %arg2: memref<1x8x32xbf16, #tpu.memory_space<vmem>>, %arg3: memref<1x8x32xbf16, #tpu.memory_space<vmem>>, %arg4: memref<1x8x32xbf16, #tpu.memory_space<vmem>>, %arg5: memref<32x32xbf16, #tpu.memory_space<vmem>>, %arg6: memref<32x32xbf16, #tpu.memory_space<vmem>>, %arg7: memref<32x32xbf16, #tpu.memory_space<vmem>>, %arg8: memref<1x32xf32, #tpu.memory_space<vmem>>, %arg9: memref<1x32xf32, #tpu.memory_space<vmem>>, %arg10: memref<1x32xf32, #tpu.memory_space<vmem>>, %arg11: memref<1x4x8x8xbf16, #tpu.memory_space<vmem>>, %arg12: memref<1x4x8x8xbf16, #tpu.memory_space<vmem>>, %arg13: memref<1x4x8x8xbf16, #tpu.memory_space<vmem>>) attributes {dimension_semantics = [#tpu.dimension_semantics<parallel>, #tpu.dimension_semantics<parallel>], iteration_bounds = array<i64: 2, 1>, scalar_prefetch = 0 : i64, scratch_operands = 0 : i64, tpu.core_type = #tpu.core_type<tc>, window_params = [{transform_indices = @transform_0, window_bounds = array<i64: 1, 8, 32>}, {transform_indices = @transform_1, window_bounds = array<i64: 1, 8, 32>}, {transform_indices = @transform_2, window_bounds = array<i64: 1, 8, 32>}, {pipeline_mode = #tpu.pipeline_mode<synchronous>, transform_indices = @transform_3, window_bounds = array<i64: 32, 32>}, {pipeline_mode = #tpu.pipeline_mode<synchronous>, transform_indices = @transform_4, window_bounds = array<i64: 32, 32>}, {pipeline_mode = #tpu.pipeline_mode<synchronous>, transform_indices = @transform_5, window_bounds = array<i64: 32, 32>}, {pipeline_mode = #tpu.pipeline_mode<synchronous>, transform_indices = @transform_6, window_bounds = array<i64: 1, 32>}, {pipeline_mode = #tpu.pipeline_mode<synchronous>, transform_indices = @transform_7, window_bounds = array<i64: 1, 32>}, {pipeline_mode = #tpu.pipeline_mode<synchronous>, transform_indices = @transform_8, window_bounds = array<i64: 1, 32>}, {transform_indices = @transform_9, window_bounds = array<i64: 1, 4, 8, 8>}, {transform_indices = @transform_10, window_bounds = array<i64: 1, 4, 8, 8>}, {transform_indices = @transform_11, window_bounds = array<i64: 1, 4, 8, 8>}]} {
    %c0 = arith.constant 0 : index
    %c0_0 = arith.constant 0 : index
    %c0_1 = arith.constant 0 : index
    %0 = vector.load %arg2[%c0, %c0_0, %c0_1] : memref<1x8x32xbf16, #tpu.memory_space<vmem>>, vector<1x8x32xbf16>
    %1 = vector.shape_cast %0 : vector<1x8x32xbf16> to vector<8x32xbf16>
    %c0_2 = arith.constant 0 : index
    %c0_3 = arith.constant 0 : index
    %2 = vector.load %arg5[%c0_2, %c0_3] : memref<32x32xbf16, #tpu.memory_space<vmem>>, vector<32x32xbf16>
    %cst = arith.constant dense<0.000000e+00> : vector<8x32xf32>
    %3 = tpu.matmul %1, %2, %cst {dimension_numbers = #tpu.dot_dimension_numbers<[1], [0], [0], [1], [0, 0, 1, 1], [], []>} : vector<8x32xbf16>, vector<32x32xbf16>, vector<8x32xf32> -> vector<8x32xf32>
    %c0_4 = arith.constant 0 : index
    %c0_5 = arith.constant 0 : index
    %4 = vector.load %arg8[%c0_4, %c0_5] : memref<1x32xf32, #tpu.memory_space<vmem>>, vector<1x32xf32>
    %5 = vector.broadcast %4 : vector<1x32xf32> to vector<8x32xf32>
    %6 = arith.addf %3, %5 : vector<8x32xf32>
    %7 = arith.truncf %6 : vector<8x32xf32> to vector<8x32xbf16>
    %8 = vector.extract_strided_slice %7 {offsets = [0, 0], sizes = [8, 8], strides = [1, 1]} : vector<8x32xbf16> to vector<8x8xbf16>
    %c0_6 = arith.constant 0 : index
    %c0_7 = arith.constant 0 : index
    %c0_8 = arith.constant 0 : index
    %c0_9 = arith.constant 0 : index
    %9 = vector.load %arg11[%c0_6, %c0_7, %c0_8, %c0_9] : memref<1x4x8x8xbf16, #tpu.memory_space<vmem>>, vector<1x1x8x8xbf16>
    %10 = vector.shape_cast %9 : vector<1x1x8x8xbf16> to vector<8x8xbf16>
    %11 = vector.shape_cast %8 : vector<8x8xbf16> to vector<1x1x8x8xbf16>
    tpu.vector_store %arg11[%c0_6, %c0_7, %c0_8, %c0_9], %11 {strides = array<i32>} : memref<1x4x8x8xbf16, #tpu.memory_space<vmem>>, vector<1x1x8x8xbf16>,
    %12 = vector.extract_strided_slice %7 {offsets = [0, 8], sizes = [8, 8], strides = [1, 1]} : vector<8x32xbf16> to vector<8x8xbf16>
    %c0_10 = arith.constant 0 : index
    %c1 = arith.constant 1 : index
    %c0_11 = arith.constant 0 : index
    %c0_12 = arith.constant 0 : index
    %13 = vector.load %arg11[%c0_10, %c1, %c0_11, %c0_12] : memref<1x4x8x8xbf16, #tpu.memory_space<vmem>>, vector<1x1x8x8xbf16>
    %14 = vector.shape_cast %13 : vector<1x1x8x8xbf16> to vector<8x8xbf16>
    %15 = vector.shape_cast %12 : vector<8x8xbf16> to vector<1x1x8x8xbf16>
    tpu.vector_store %arg11[%c0_10, %c1, %c0_11, %c0_12], %15 {strides = array<i32>} : memref<1x4x8x8xbf16, #tpu.memory_space<vmem>>, vector<1x1x8x8xbf16>,
    %16 = vector.extract_strided_slice %7 {offsets = [0, 16], sizes = [8, 8], strides = [1, 1]} : vector<8x32xbf16> to vector<8x8xbf16>
    %c0_13 = arith.constant 0 : index
    %c2 = arith.constant 2 : index
    %c0_14 = arith.constant 0 : index
    %c0_15 = arith.constant 0 : index
    %17 = vector.load %arg11[%c0_13, %c2, %c0_14, %c0_15] : memref<1x4x8x8xbf16, #tpu.memory_space<vmem>>, vector<1x1x8x8xbf16>
    %18 = vector.shape_cast %17 : vector<1x1x8x8xbf16> to vector<8x8xbf16>
    %19 = vector.shape_cast %16 : vector<8x8xbf16> to vector<1x1x8x8xbf16>
    tpu.vector_store %arg11[%c0_13, %c2, %c0_14, %c0_15], %19 {strides = array<i32>} : memref<1x4x8x8xbf16, #tpu.memory_space<vmem>>, vector<1x1x8x8xbf16>,
    %20 = vector.extract_strided_slice %7 {offsets = [0, 24], sizes = [8, 8], strides = [1, 1]} : vector<8x32xbf16> to vector<8x8xbf16>
    %c0_16 = arith.constant 0 : index
    %c3 = arith.constant 3 : index
    %c0_17 = arith.constant 0 : index
    %c0_18 = arith.constant 0 : index
    %21 = vector.load %arg11[%c0_16, %c3, %c0_17, %c0_18] : memref<1x4x8x8xbf16, #tpu.memory_space<vmem>>, vector<1x1x8x8xbf16>
    %22 = vector.shape_cast %21 : vector<1x1x8x8xbf16> to vector<8x8xbf16>
    %23 = vector.shape_cast %20 : vector<8x8xbf16> to vector<1x1x8x8xbf16>
    tpu.vector_store %arg11[%c0_16, %c3, %c0_17, %c0_18], %23 {strides = array<i32>} : memref<1x4x8x8xbf16, #tpu.memory_space<vmem>>, vector<1x1x8x8xbf16>,
    %c0_19 = arith.constant 0 : index
    %c0_20 = arith.constant 0 : index
    %c0_21 = arith.constant 0 : index
    %24 = vector.load %arg3[%c0_19, %c0_20, %c0_21] : memref<1x8x32xbf16, #tpu.memory_space<vmem>>, vector<1x8x32xbf16>
    %25 = vector.shape_cast %24 : vector<1x8x32xbf16> to vector<8x32xbf16>
    %c0_22 = arith.constant 0 : index
    %c0_23 = arith.constant 0 : index
    %26 = vector.load %arg6[%c0_22, %c0_23] : memref<32x32xbf16, #tpu.memory_space<vmem>>, vector<32x32xbf16>
    %cst_24 = arith.constant dense<0.000000e+00> : vector<8x32xf32>
    %27 = tpu.matmul %25, %26, %cst_24 {dimension_numbers = #tpu.dot_dimension_numbers<[1], [0], [0], [1], [0, 0, 1, 1], [], []>} : vector<8x32xbf16>, vector<32x32xbf16>, vector<8x32xf32> -> vector<8x32xf32>
    %c0_25 = arith.constant 0 : index
    %c0_26 = arith.constant 0 : index
    %28 = vector.load %arg9[%c0_25, %c0_26] : memref<1x32xf32, #tpu.memory_space<vmem>>, vector<1x32xf32>
    %29 = vector.broadcast %28 : vector<1x32xf32> to vector<8x32xf32>
    %30 = arith.addf %27, %29 : vector<8x32xf32>
    %31 = arith.truncf %30 : vector<8x32xf32> to vector<8x32xbf16>
    %32 = vector.extract_strided_slice %31 {offsets = [0, 0], sizes = [8, 8], strides = [1, 1]} : vector<8x32xbf16> to vector<8x8xbf16>
    %c0_27 = arith.constant 0 : index
    %c0_28 = arith.constant 0 : index
    %c0_29 = arith.constant 0 : index
    %c0_30 = arith.constant 0 : index
    %33 = vector.load %arg12[%c0_27, %c0_28, %c0_29, %c0_30] : memref<1x4x8x8xbf16, #tpu.memory_space<vmem>>, vector<1x1x8x8xbf16>
    %34 = vector.shape_cast %33 : vector<1x1x8x8xbf16> to vector<8x8xbf16>
    %35 = vector.shape_cast %32 : vector<8x8xbf16> to vector<1x1x8x8xbf16>
    tpu.vector_store %arg12[%c0_27, %c0_28, %c0_29, %c0_30], %35 {strides = array<i32>} : memref<1x4x8x8xbf16, #tpu.memory_space<vmem>>, vector<1x1x8x8xbf16>,
    %36 = vector.extract_strided_slice %31 {offsets = [0, 8], sizes = [8, 8], strides = [1, 1]} : vector<8x32xbf16> to vector<8x8xbf16>
    %c0_31 = arith.constant 0 : index
    %c1_32 = arith.constant 1 : index
    %c0_33 = arith.constant 0 : index
    %c0_34 = arith.constant 0 : index
    %37 = vector.load %arg12[%c0_31, %c1_32, %c0_33, %c0_34] : memref<1x4x8x8xbf16, #tpu.memory_space<vmem>>, vector<1x1x8x8xbf16>
    %38 = vector.shape_cast %37 : vector<1x1x8x8xbf16> to vector<8x8xbf16>
    %39 = vector.shape_cast %36 : vector<8x8xbf16> to vector<1x1x8x8xbf16>
    tpu.vector_store %arg12[%c0_31, %c1_32, %c0_33, %c0_34], %39 {strides = array<i32>} : memref<1x4x8x8xbf16, #tpu.memory_space<vmem>>, vector<1x1x8x8xbf16>,
    %40 = vector.extract_strided_slice %31 {offsets = [0, 16], sizes = [8, 8], strides = [1, 1]} : vector<8x32xbf16> to vector<8x8xbf16>
    %c0_35 = arith.constant 0 : index
    %c2_36 = arith.constant 2 : index
    %c0_37 = arith.constant 0 : index
    %c0_38 = arith.constant 0 : index
    %41 = vector.load %arg12[%c0_35, %c2_36, %c0_37, %c0_38] : memref<1x4x8x8xbf16, #tpu.memory_space<vmem>>, vector<1x1x8x8xbf16>
    %42 = vector.shape_cast %41 : vector<1x1x8x8xbf16> to vector<8x8xbf16>
    %43 = vector.shape_cast %40 : vector<8x8xbf16> to vector<1x1x8x8xbf16>
    tpu.vector_store %arg12[%c0_35, %c2_36, %c0_37, %c0_38], %43 {strides = array<i32>} : memref<1x4x8x8xbf16, #tpu.memory_space<vmem>>, vector<1x1x8x8xbf16>,
    %44 = vector.extract_strided_slice %31 {offsets = [0, 24], sizes = [8, 8], strides = [1, 1]} : vector<8x32xbf16> to vector<8x8xbf16>
    %c0_39 = arith.constant 0 : index
    %c3_40 = arith.constant 3 : index
    %c0_41 = arith.constant 0 : index
    %c0_42 = arith.constant 0 : index
    %45 = vector.load %arg12[%c0_39, %c3_40, %c0_41, %c0_42] : memref<1x4x8x8xbf16, #tpu.memory_space<vmem>>, vector<1x1x8x8xbf16>
    %46 = vector.shape_cast %45 : vector<1x1x8x8xbf16> to vector<8x8xbf16>
    %47 = vector.shape_cast %44 : vector<8x8xbf16> to vector<1x1x8x8xbf16>
    tpu.vector_store %arg12[%c0_39, %c3_40, %c0_41, %c0_42], %47 {strides = array<i32>} : memref<1x4x8x8xbf16, #tpu.memory_space<vmem>>, vector<1x1x8x8xbf16>,
    %c0_43 = arith.constant 0 : index
    %c0_44 = arith.constant 0 : index
    %c0_45 = arith.constant 0 : index
    %48 = vector.load %arg4[%c0_43, %c0_44, %c0_45] : memref<1x8x32xbf16, #tpu.memory_space<vmem>>, vector<1x8x32xbf16>
    %49 = vector.shape_cast %48 : vector<1x8x32xbf16> to vector<8x32xbf16>
    %c0_46 = arith.constant 0 : index
    %c0_47 = arith.constant 0 : index
    %50 = vector.load %arg7[%c0_46, %c0_47] : memref<32x32xbf16, #tpu.memory_space<vmem>>, vector<32x32xbf16>
    %cst_48 = arith.constant dense<0.000000e+00> : vector<8x32xf32>
    %51 = tpu.matmul %49, %50, %cst_48 {dimension_numbers = #tpu.dot_dimension_numbers<[1], [0], [0], [1], [0, 0, 1, 1], [], []>} : vector<8x32xbf16>, vector<32x32xbf16>, vector<8x32xf32> -> vector<8x32xf32>
    %c0_49 = arith.constant 0 : index
    %c0_50 = arith.constant 0 : index
    %52 = vector.load %arg10[%c0_49, %c0_50] : memref<1x32xf32, #tpu.memory_space<vmem>>, vector<1x32xf32>
    %53 = vector.broadcast %52 : vector<1x32xf32> to vector<8x32xf32>
    %54 = arith.addf %51, %53 : vector<8x32xf32>
    %55 = arith.truncf %54 : vector<8x32xf32> to vector<8x32xbf16>
    %56 = vector.extract_strided_slice %55 {offsets = [0, 0], sizes = [8, 8], strides = [1, 1]} : vector<8x32xbf16> to vector<8x8xbf16>
    %c0_51 = arith.constant 0 : index
    %c0_52 = arith.constant 0 : index
    %c0_53 = arith.constant 0 : index
    %c0_54 = arith.constant 0 : index
    %57 = vector.load %arg13[%c0_51, %c0_52, %c0_53, %c0_54] : memref<1x4x8x8xbf16, #tpu.memory_space<vmem>>, vector<1x1x8x8xbf16>
    %58 = vector.shape_cast %57 : vector<1x1x8x8xbf16> to vector<8x8xbf16>
    %59 = vector.shape_cast %56 : vector<8x8xbf16> to vector<1x1x8x8xbf16>
    tpu.vector_store %arg13[%c0_51, %c0_52, %c0_53, %c0_54], %59 {strides = array<i32>} : memref<1x4x8x8xbf16, #tpu.memory_space<vmem>>, vector<1x1x8x8xbf16>,
    %60 = vector.extract_strided_slice %55 {offsets = [0, 8], sizes = [8, 8], strides = [1, 1]} : vector<8x32xbf16> to vector<8x8xbf16>
    %c0_55 = arith.constant 0 : index
    %c1_56 = arith.constant 1 : index
    %c0_57 = arith.constant 0 : index
    %c0_58 = arith.constant 0 : index
    %61 = vector.load %arg13[%c0_55, %c1_56, %c0_57, %c0_58] : memref<1x4x8x8xbf16, #tpu.memory_space<vmem>>, vector<1x1x8x8xbf16>
    %62 = vector.shape_cast %61 : vector<1x1x8x8xbf16> to vector<8x8xbf16>
    %63 = vector.shape_cast %60 : vector<8x8xbf16> to vector<1x1x8x8xbf16>
    tpu.vector_store %arg13[%c0_55, %c1_56, %c0_57, %c0_58], %63 {strides = array<i32>} : memref<1x4x8x8xbf16, #tpu.memory_space<vmem>>, vector<1x1x8x8xbf16>,
    %64 = vector.extract_strided_slice %55 {offsets = [0, 16], sizes = [8, 8], strides = [1, 1]} : vector<8x32xbf16> to vector<8x8xbf16>
    %c0_59 = arith.constant 0 : index
    %c2_60 = arith.constant 2 : index
    %c0_61 = arith.constant 0 : index
    %c0_62 = arith.constant 0 : index
    %65 = vector.load %arg13[%c0_59, %c2_60, %c0_61, %c0_62] : memref<1x4x8x8xbf16, #tpu.memory_space<vmem>>, vector<1x1x8x8xbf16>
    %66 = vector.shape_cast %65 : vector<1x1x8x8xbf16> to vector<8x8xbf16>
    %67 = vector.shape_cast %64 : vector<8x8xbf16> to vector<1x1x8x8xbf16>
    tpu.vector_store %arg13[%c0_59, %c2_60, %c0_61, %c0_62], %67 {strides = array<i32>} : memref<1x4x8x8xbf16, #tpu.memory_space<vmem>>, vector<1x1x8x8xbf16>,
    %68 = vector.extract_strided_slice %55 {offsets = [0, 24], sizes = [8, 8], strides = [1, 1]} : vector<8x32xbf16> to vector<8x8xbf16>
    %c0_63 = arith.constant 0 : index
    %c3_64 = arith.constant 3 : index
    %c0_65 = arith.constant 0 : index
    %c0_66 = arith.constant 0 : index
    %69 = vector.load %arg13[%c0_63, %c3_64, %c0_65, %c0_66] : memref<1x4x8x8xbf16, #tpu.memory_space<vmem>>, vector<1x1x8x8xbf16>
    %70 = vector.shape_cast %69 : vector<1x1x8x8xbf16> to vector<8x8xbf16>
    %71 = vector.shape_cast %68 : vector<8x8xbf16> to vector<1x1x8x8xbf16>
    tpu.vector_store %arg13[%c0_63, %c3_64, %c0_65, %c0_66], %71 {strides = array<i32>} : memref<1x4x8x8xbf16, #tpu.memory_space<vmem>>, vector<1x1x8x8xbf16>,
    return
  }
  func.func @transform_0(%arg0: i32, %arg1: i32) -> (i32, i32, i32) {
    %c0_i32 = arith.constant 0 : i32
    %c0_i32_0 = arith.constant 0 : i32
    return %arg0, %arg1, %c0_i32 : i32, i32, i32
  }
  func.func @transform_1(%arg0: i32, %arg1: i32) -> (i32, i32, i32) {
    %c0_i32 = arith.constant 0 : i32
    %c0_i32_0 = arith.constant 0 : i32
    return %arg0, %arg1, %c0_i32 : i32, i32, i32
  }
  func.func @transform_2(%arg0: i32, %arg1: i32) -> (i32, i32, i32) {
    %c0_i32 = arith.constant 0 : i32
    %c0_i32_0 = arith.constant 0 : i32
    return %arg0, %arg1, %c0_i32 : i32, i32, i32
  }
  func.func @transform_3(%arg0: i32, %arg1: i32) -> (i32, i32) {
    %c0_i32 = arith.constant 0 : i32
    %c0_i32_0 = arith.constant 0 : i32
    %c0_i32_1 = arith.constant 0 : i32
    return %c0_i32, %c0_i32_0 : i32, i32
  }
  func.func @transform_4(%arg0: i32, %arg1: i32) -> (i32, i32) {
    %c0_i32 = arith.constant 0 : i32
    %c0_i32_0 = arith.constant 0 : i32
    %c0_i32_1 = arith.constant 0 : i32
    return %c0_i32, %c0_i32_0 : i32, i32
  }
  func.func @transform_5(%arg0: i32, %arg1: i32) -> (i32, i32) {
    %c0_i32 = arith.constant 0 : i32
    %c0_i32_0 = arith.constant 0 : i32
    %c0_i32_1 = arith.constant 0 : i32
    return %c0_i32, %c0_i32_0 : i32, i32
  }
  func.func @transform_6(%arg0: i32, %arg1: i32) -> (i32, i32) {
    %c0_i32 = arith.constant 0 : i32
    %c0_i32_0 = arith.constant 0 : i32
    %c0_i32_1 = arith.constant 0 : i32
    return %c0_i32, %c0_i32_0 : i32, i32
  }
  func.func @transform_7(%arg0: i32, %arg1: i32) -> (i32, i32) {
    %c0_i32 = arith.constant 0 : i32
    %c0_i32_0 = arith.constant 0 : i32
    %c0_i32_1 = arith.constant 0 : i32
    return %c0_i32, %c0_i32_0 : i32, i32
  }
  func.func @transform_8(%arg0: i32, %arg1: i32) -> (i32, i32) {
    %c0_i32 = arith.constant 0 : i32
    %c0_i32_0 = arith.constant 0 : i32
    %c0_i32_1 = arith.constant 0 : i32
    return %c0_i32, %c0_i32_0 : i32, i32
  }
  func.func @transform_9(%arg0: i32, %arg1: i32) -> (i32, i32, i32, i32) {
    %c0_i32 = arith.constant 0 : i32
    %c0_i32_0 = arith.constant 0 : i32
    %c0_i32_1 = arith.constant 0 : i32
    return %arg0, %c0_i32, %arg1, %c0_i32_0 : i32, i32, i32, i32
  }
  func.func @transform_10(%arg0: i32, %arg1: i32) -> (i32, i32, i32, i32) {
    %c0_i32 = arith.constant 0 : i32
    %c0_i32_0 = arith.constant 0 : i32
    %c0_i32_1 = arith.constant 0 : i32
    return %arg0, %c0_i32, %arg1, %c0_i32_0 : i32, i32, i32, i32
  }
  func.func @transform_11(%arg0: i32, %arg1: i32) -> (i32, i32, i32, i32) {
    %c0_i32 = arith.constant 0 : i32
    %c0_i32_0 = arith.constant 0 : i32
    %c0_i32_1 = arith.constant 0 : i32
    return %arg0, %c0_i32, %arg1, %c0_i32_0 : i32, i32, i32, i32
  }
}

</mosaic_0001>

<bundles_post_ra>
// kernel: tpu_custom_call.1
= control target key start
LH: loop header
LB: loop body
LE: loop exit
PB: predicated region body
PF: predicated region fallthrough
CT: control target
= control target key end

     0   :  { %s2134_s0 = inlined_call_operand.hbm [shape: bf16[2,8,32], index: 0, kind: input, shape index: {}]   ;;  %s2135_s1 = inlined_call_operand.hbm [shape: bf16[2,8,32], index: 1, kind: input, shape index: {}]   ;;  %s2136_s2 = inlined_call_operand.hbm [shape: bf16[2,8,32], index: 2, kind: input, shape index: {}]   ;;  %s2137_s3 = inlined_call_operand.hbm [shape: bf16[32,32], index: 3, kind: input, shape index: {}]   ;;  %s2138_s4 = inlined_call_operand.hbm [shape: bf16[32,32], index: 4, kind: input, shape index: {}]   ;;  %s2139_s5 = inlined_call_operand.vmem [shape: bf16[32,32], index: 5, kind: input, shape index: {}]   ;;  %s2140_s6 = inlined_call_operand.vmem [shape: f32[1,32], index: 6, kind: input, shape index: {}]   ;;  %s2141_s7 = inlined_call_operand.vmem [shape: f32[1,32], index: 7, kind: input, shape index: {}]   ;;  %s2142_s8 = inlined_call_operand.vmem [shape: f32[1,32], index: 8, kind: input, shape index: {}]   ;;  %s2143_s9 = inlined_call_operand.hbm [shape: bf16[2,4,8,8], index: 9, kind: output, shape index: {0}]   ;;  %s2144_s10 = inlined_call_operand.hbm [shape: bf16[2,4,8,8], index: 10, kind: output, shape index: {1}]   ;;  %s2145_s11 = inlined_call_operand.hbm [shape: bf16[2,4,8,8], index: 11, kind: output, shape index: {2}]  }
   0x1   :  { %2170 = sst [smem:[#allocation26_spill]] %s2135_s1 }
   0x2   :  { %2171 = sst [smem:[#allocation27_spill]] %s2137_s3 }
   0x3   :  { %2172 = sst [smem:[#allocation28_spill]] %s2138_s4 }
   0x4   :  { %2173 = sst [smem:[#allocation29_spill]] %s2143_s9 }
   0x5   :  { %2174 = sst [smem:[#allocation30_spill]] %s2144_s10 }
   0x6   :  { %2175 = sst [smem:[#allocation31_spill]] %s2145_s11 }
   0x7   :  { %17 = vsyncpa [#allocation3], 0 }
   0x8   :  { %19 = vsyncpa [#allocation3 + $0x1], 0 }
   0x9   :  { %20 = vsyncpa [#allocation6], 0 }
   0xa   :  { %22 = vsyncpa [#allocation6 + $0x1], 0 }
   0xb   :  { %23 = vsyncpa [#allocation9], 0 }
   0xc   :  { %24 = vsyncpa [#allocation4], 0 }
   0xd   :  { %26 = vsyncpa [#allocation4 + $0x1], 0 }
   0xe   :  { %27 = vsyncpa [#allocation13], 0 }
   0xf   :  { %29 = vsyncpa [#allocation13 + $0x1], 0  ;;  %s1671_s17 = smov 0   ;;  %s1673_s18 = smov 0  }
  0x10   :  { %s1675_s19 = smov 0   ;;  %s1677_s20 = smov 0  }
  0x11   :  { %s1679_s21 = smov 0   ;;  %s1681_s22 = smov 0  }
  0x12 LB: > { %2176 = sst [smem:[#allocation20_spill]] %s1572_s17  ;;  %s1702_s23 = sadd.s32 4294967295, %s1592_s22   ;;  %s1592_s22 = sphi %s1681_s22, %s35_s22   ;;  %s1588_s21 = sphi %s1679_s21, %s2218_s21   ;;  %s1584_s20 = sphi %s1677_s20, %s2222_s20   ;;  %s1580_s19 = sphi %s1675_s19, %s2221_s19   ;;  %s1576_s18 = sphi %s1673_s18, %s2220_s18   ;;  %s1572_s17 = sphi %s1671_s17, %s2219_s17  }
  0x13   : > { %2177 = sst [smem:[#allocation21_spill]] %s1588_s21  ;;  %s2146_s24 = sadd.s32 4294967294, %s1592_s22  }
  0x14   : > { %2178 = sst [smem:[#allocation22_spill]] %s1592_s22  ;;  %p69_p0 = scmp.ne.s32.totalorder %s1576_s18, %s1572_s17 }
  0x15   : > { %p2149_p1 = scmp.eq.s32.totalorder %s1702_s23, 0  ;;  %p283_p3 = scmp.eq.s32.totalorder %s2146_s24, 1 }
  0x16   : > { %p1085_p5 = scmp.ge.s32.totalorder %s1592_s22, 1  ;;  %p346_p7 = scmp.lt.s32.totalorder %s1592_s22, 3 }
  0x17   : > { %p1713_p4 = por %p2149_p1, %p69_p0  ;;  %p1718_p6 = por %p283_p3, %p69_p0 }
  0x18   : > { %p1723_p8 = pnand %p1085_p5, %p346_p7  ;;  %s1594_s28 = smov [#allocation8]  }
  0x19   : > { %s2179_s25 = scalar_select %p1713_p4, 1, 0 }
  0x1a   : > { %s2180_s26 = scalar_select %p1718_p6, 1, 0 }
  0x1b   : > { %s2182_s27 = scalar_select %p1723_p8, 1, 0 }
  0x1c   : > { %2181 = sst [smem:[#allocation23_spill]] %s2180_s26  ;;  %s358_s29 = sshll.u32 %s1594_s28, 4  ;;  %s359_s29 = int_to_ptr.vmem [resolvable:$true] %s358_s29 }
  0x1d   : > { %p1198_p9 = pneg %p1723_p8  ;;  %s47_s12 = sadd.s32 1, %s1588_s21 }
  0x1e   : > { %s2184_s3 = sld [smem:[#allocation27_spill]] }
  0x1f   : > { %p1732_p11 = pnand %p1198_p9, %p2149_p1 }
  0x21   : > { %s2183_s30 = scalar_select %p1732_p11, 1, 0 }
  0x22   : > { %p2162_p13 = pneg %p1732_p11 }
  0x24   : > { %s1296_s15 = scalar_lea.hbm %s2184_s3, 256 }
  0x25   : > { %p1297_p12 = scmp.ne.s32.totalorder %s2184_s3, %s1296_s15  ;;  %p1303_p5 = scmp.lt.u32.totalorder %s1296_s15, %s2184_s3 }
  0x27   : > { %p1299_p0 = pnand %p2162_p13, %p1297_p12 }
  0x29   : > { %p1300_p3 = pneg %p1299_p0 }
  0x2b   : > { %p1305_p7 = pnand %p1303_p5, %p1300_p3 }
  0x2d   : > { %1308 = shalt.err (!%p1305_p7)
}
  0x2e   : > { %s1309_s17 = scalar_lea.vmem %s359_s29, 256  ;;  %p1317_p2 = scmp.lt.s32.totalorder %s359_s29, %s359_s29 }
  0x2f   : > { %p1310_p9 = scmp.ne.s32.totalorder %s359_s29, %s1309_s17  ;;  %p1318_p6 = scmp.lt.s32.totalorder %s1309_s17, %s1309_s17 }
  0x31   : > { %p1312_p10 = pnand %p1310_p9, %p2162_p13  ;;  %p1319_p4 = por %p1318_p6, %p1317_p2 }
  0x33   : > { %p1313_p1 = pneg %p1312_p10 }
  0x35   : > { %p1320_p8 = pnand %p1319_p4, %p1313_p1 }
  0x37   : > { %1323 = shalt.err (!%p1320_p8)
}
  0x38   : > { %s2152_s24 = smov 64   ;;  %s2153_s26 = smov 4  }
  0x39   : > { %1201 = dma.hbm_to_vmem [thread:$0]  (!%p1732_p11), %s2184_s3, 256, %s359_s29, [#allocation9], %s2152_s24, %s2152_s24, %s2153_s26  }
  0x3a   : > { %p49_p1 = scmp.ge.s32.totalorder %s47_s12, 2  ;;  %s56_s14 = sadd.s32 1, %s1580_s19 }
  0x3b   : > { %p63_p2 = scmp.ne.s32.totalorder %s1580_s19, %s1576_s18  ;;  %p64_p4 = scmp.eq.s32.totalorder %s1592_s22, 0 }
  0x3c   : > { %s2224_s12 = smov (%p49_p1, %s47_s12), 0  ;;  %p2186_p8 = scmp.eq.s32.totalorder %s1702_s23, 1 }
  0x3d   : > { %2185 = sst [smem:[#allocation24_spill]] %s2224_s12  ;;  %p65_p6 = por %p64_p4, %p63_p2 }
  0x3e   : > { %p1770_p10 = por %p2186_p8, %p63_p2  ;;  %s51_s16 = ssub.s32 %s1588_s21, %s2224_s12 }
  0x3f   : > { %p1227_p12 = scmp.lt.s32.totalorder %s1592_s22, 2  ;;  %p54_p0 = scmp.eq.s32.totalorder %s51_s16, 0 }
  0x40   : > { %s2187_s15 = scalar_select %p1770_p10, 1, 0 }
  0x41   : > { %s2155_s28 = sand.u32 1, %s1580_s19   ;;  %s1783_s17 = sshll.u32 %s1588_s21, 6 }
  0x42   : > { %s1780_s29 = sshll.u32 %s2155_s28, 2  ;;  %p1788_p3 = pnand %p1227_p12, %p65_p6 }
  0x43   : > { %s1786_s13 = scalar_select %p54_p0, %s1580_s19, %s56_s14  }
  0x44   : > { %s2189_s24 = scalar_select %p1788_p3, 1, 0 }
  0x45   : > { %2188 = sst [smem:[#allocation25_spill]] %s1786_s13  ;;  %s416_s26 = sand.u32 1, %s1592_s22  }
  0x46   : > { %s2190_s1 = sld [smem:[#allocation26_spill]]  ;;  %s420_s28 = scalar_lea.vmem [#allocation5], %s1780_s29 }
  0x47   : > { %s428_s21 = sshll.u32 %s420_s28, 4  ;;  %s1597_s14 = smov [#allocation10]   ;;  %s1800_s21 = int_to_ptr.vmem [resolvable:$true] %s428_s21 }
  0x48   : > { %s1802_s13 = sshll.u32 %s1597_s14, 4  ;;  %s1804_s11 = scalar_lea.sflag [#allocation6], %s416_s26  ;;  %s372_s13 = int_to_ptr.vmem [resolvable:$true] %s1802_s13 }
  0x49   : > { %p1810_p7 = pneg %p1788_p3 }
  0x4b   : > { %s2191_s3 = scalar_select %p1810_p7, 1, 0 }
  0x4c   : > { %s1797_s16 = scalar_lea.hbm %s2190_s1, %s1783_s17  ;;  %s1329_s22 = scalar_lea.hbm %s2190_s1, 128 }
  0x4d   : > { %s1324_s9 = scalar_lea.hbm %s1797_s16, 64  ;;  %p1330_p2 = scmp.lt.u32.totalorder %s1797_s16, %s2190_s1 }
  0x4e   : > { %p1325_p5 = scmp.ne.s32.totalorder %s1797_s16, %s1324_s9  ;;  %p1331_p4 = scmp.lt.u32.totalorder %s1329_s22, %s1324_s9 }
  0x4f   : > { %p1333_p8 = scmp.lt.u32.totalorder %s1324_s9, %s1797_s16 }
  0x50   : > { %p1327_p9 = pnand %p1810_p7, %p1325_p5  ;;  %p1332_p6 = por %p1331_p4, %p1330_p2 }
  0x52   : > { %p1328_p1 = pneg %p1327_p9  ;;  %p1334_p12 = por %p1333_p8, %p1332_p6 }
  0x54   : > { %p1335_p0 = pnand %p1334_p12, %p1328_p1 }
  0x56   : > { %1338 = shalt.err (!%p1335_p0)
}
  0x57   : > { %s1339_s26 = scalar_lea.vmem %s1800_s21, 64  ;;  %s1598_s12 = smov [#allocation5]  }
  0x58   : > { %p1340_p5 = scmp.ne.s32.totalorder %s1800_s21, %s1339_s26  ;;  %s1344_s28 = sshll.u32 %s1598_s12, 4  ;;  %s1345_s28 = int_to_ptr.vmem [resolvable:$false] %s1344_s28 }
  0x59   : > { %s1346_s10 = scalar_lea.vmem %s1345_s28, 128  ;;  %p1347_p10 = scmp.lt.s32.totalorder %s1800_s21, %s1345_s28 }
  0x5a   : > { %p1342_p9 = pnand %p1340_p5, %p1810_p7  ;;  %p1348_p11 = scmp.lt.s32.totalorder %s1346_s10, %s1339_s26 }
  0x5c   : > { %p1343_p13 = pneg %p1342_p9  ;;  %p1349_p2 = por %p1348_p11, %p1347_p10 }
  0x5e   : > { %p1350_p4 = pnand %p1349_p2, %p1343_p13 }
  0x60   : > { %1353 = shalt.err (!%p1350_p4)
}
  0x61   : > { %1211 = dma.hbm_to_vmem [thread:$0]  (!%p1788_p3), %s1797_s16, 64, %s1800_s21, %s1804_s11  }
  0x62   : > { %s2192_s4 = sld [smem:[#allocation28_spill]]  ;;  %p2193_p11 = scmp.ne.s32.totalorder %s2183_s30, 0 }
  0x64   : > { %p2194_p13 = pneg %p2193_p11 }
  0x68   : > { %s1354_s14 = scalar_lea.hbm %s2192_s4, 256 }
  0x69   : > { %p1355_p1 = scmp.ne.s32.totalorder %s2192_s4, %s1354_s14  ;;  %p1361_p8 = scmp.lt.u32.totalorder %s1354_s14, %s2192_s4 }
  0x6b   : > { %p1357_p10 = pnand %p1355_p1, %p2194_p13 }
  0x6d   : > { %p1358_p6 = pneg %p1357_p10 }
  0x6f   : > { %p1363_p12 = pnand %p1361_p8, %p1358_p6 }
  0x71   : > { %1366 = shalt.err (!%p1363_p12)
}
  0x72   : > { %s1367_s21 = scalar_lea.vmem %s372_s13, 256  ;;  %p2195_p5 = pmov %p2194_p13 }
  0x73   : > { %p1368_p0 = scmp.ne.s32.totalorder %s372_s13, %s1367_s21  ;;  %p1375_p4 = scmp.lt.s32.totalorder %s372_s13, %s372_s13 }
  0x74   : > { %p1376_p3 = scmp.lt.s32.totalorder %s1367_s21, %s1367_s21 }
  0x75   : > { %p1370_p9 = pnand %p1368_p0, %p2195_p5 }
  0x76   : > { %p1377_p7 = por %p1376_p3, %p1375_p4 }
  0x77   : > { %p1371_p2 = pneg %p1370_p9 }
  0x79   : > { %p1378_p1 = pnand %p1377_p7, %p1371_p2 }
  0x7b   : > { %1381 = shalt.err (!%p1378_p1)
}
  0x7c   : > { %s2196_s1 = smov 4   ;;  %s2197_s16 = smov 64  }
  0x7d   : > { %1204 = dma.hbm_to_vmem [thread:$0]  (!%p2193_p11), %s2192_s4, 256, %s372_s13, [#allocation9], %s2197_s16, %s2197_s16, %s2196_s1  }
  0x7e   : > { %s1862_s12 = scalar_lea.hbm %s2134_s0, %s1783_s17  ;;  %s401_s30 = scalar_lea.vmem [#allocation2], %s1780_s29 }
  0x7f   : > { %s409_s26 = sshll.u32 %s401_s30, 4  ;;  %s1871_s10 = scalar_lea.hbm %s2136_s2, %s1783_s17  ;;  %s1865_s26 = int_to_ptr.vmem [resolvable:$true] %s409_s26 }
  0x80   : > { %s2198_s9 = sand.u32 1, %s1580_s19   ;;  %s1382_s1 = scalar_lea.hbm %s1862_s12, 64 }
  0x81   : > { %s398_s13 = scalar_lea.sflag [#allocation3], %s2198_s9  ;;  %p1383_p3 = scmp.ne.s32.totalorder %s1862_s12, %s1382_s1 }
  0x82   : > { %p2199_p7 = scmp.ne.s32.totalorder %s2191_s3, 0  ;;  %s1387_s14 = scalar_lea.hbm %s2134_s0, 128 }
  0x83   : > { %p1388_p10 = scmp.lt.u32.totalorder %s1862_s12, %s2134_s0  ;;  %p1389_p6 = scmp.lt.u32.totalorder %s1387_s14, %s1382_s1 }
  0x84   : > { %p1385_p11 = pnand %p1383_p3, %p2199_p7  ;;  %p1391_p12 = scmp.lt.u32.totalorder %s1382_s1, %s1862_s12 }
  0x85   : > { %p1390_p8 = por %p1389_p6, %p1388_p10 }
  0x86   : > { %p1386_p13 = pneg %p1385_p11 }
  0x87   : > { %p1392_p0 = por %p1391_p12, %p1390_p8 }
  0x89   : > { %p1393_p5 = pnand %p1392_p0, %p1386_p13 }
  0x8b   : > { %1396 = shalt.err (!%p1393_p5)
}
  0x8c   : > { %s1397_s17 = scalar_lea.vmem %s1865_s26, 64  ;;  %s1599_s28 = smov [#allocation2]  }
  0x8d   : > { %p1398_p9 = scmp.ne.s32.totalorder %s1865_s26, %s1397_s17  ;;  %s1402_s21 = sshll.u32 %s1599_s28, 4  ;;  %s1403_s21 = int_to_ptr.vmem [resolvable:$false] %s1402_s21 }
  0x8e   : > { %s1404_s4 = scalar_lea.vmem %s1403_s21, 128  ;;  %p1405_p1 = scmp.lt.s32.totalorder %s1865_s26, %s1403_s21 }
  0x8f   : > { %p1400_p2 = pnand %p1398_p9, %p2199_p7  ;;  %p1406_p3 = scmp.lt.s32.totalorder %s1404_s4, %s1397_s17 }
  0x91   : > { %p1401_p4 = pneg %p1400_p2  ;;  %p1407_p11 = por %p1406_p3, %p1405_p1 }
  0x93   : > { %p1408_p10 = pnand %p1407_p11, %p1401_p4 }
  0x95   : > { %1411 = shalt.err (!%p1408_p10)
}
  0x96   : > { %p2200_p13 = scmp.ne.s32.totalorder %s2189_s24, 0  ;;  %s439_s9 = scalar_lea.vmem [#allocation7], %s1780_s29 }
  0x97   : > { %s447_s1 = sshll.u32 %s439_s9, 4  ;;  %s1412_s16 = scalar_lea.hbm %s1871_s10, 64  ;;  %s448_s1 = int_to_ptr.vmem [resolvable:$true] %s447_s1 }
  0x98   : > { %1208 = dma.hbm_to_vmem [thread:$0]  (!%p2200_p13), %s1862_s12, 64, %s1865_s26, %s398_s13  }
  0x99   : > { %p1413_p6 = scmp.ne.s32.totalorder %s1871_s10, %s1412_s16  ;;  %s1417_s30 = scalar_lea.hbm %s2136_s2, 128 }
  0x9a   : > { %p1418_p0 = scmp.lt.u32.totalorder %s1871_s10, %s2136_s2  ;;  %p1419_p5 = scmp.lt.u32.totalorder %s1417_s30, %s1412_s16 }
  0x9b   : > { %p1415_p8 = pnand %p1413_p6, %p2199_p7  ;;  %p1421_p2 = scmp.lt.u32.totalorder %s1412_s16, %s1871_s10 }
  0x9c   : > { %p1420_p9 = por %p1419_p5, %p1418_p0 }
  0x9d   : > { %p1416_p12 = pneg %p1415_p8 }
  0x9e   : > { %p1422_p4 = por %p1421_p2, %p1420_p9 }
  0xa0   : > { %p1423_p1 = pnand %p1422_p4, %p1416_p12 }
  0xa2   : > { %1426 = shalt.err (!%p1423_p1)
}
  0xa3   : > { %s1427_s29 = scalar_lea.vmem %s448_s1, 64  ;;  %s1600_s12 = smov [#allocation7]  }
  0xa4   : > { %p1428_p3 = scmp.ne.s32.totalorder %s448_s1, %s1427_s29  ;;  %s1432_s26 = sshll.u32 %s1600_s12, 4  ;;  %s1433_s26 = int_to_ptr.vmem [resolvable:$false] %s1432_s26 }
  0xa5   : > { %s1434_s13 = scalar_lea.vmem %s1433_s26, 128  ;;  %p1435_p6 = scmp.lt.s32.totalorder %s448_s1, %s1433_s26 }
  0xa6   : > { %p1430_p11 = pnand %p1428_p3, %p2199_p7  ;;  %p1436_p8 = scmp.lt.s32.totalorder %s1434_s13, %s1427_s29 }
  0xa8   : > { %p1431_p10 = pneg %p1430_p11  ;;  %p1437_p13 = por %p1436_p8, %p1435_p6 }
  0xaa   : > { %p1438_p0 = pnand %p1437_p13, %p1431_p10 }
  0xac   : > { %1441 = shalt.err (!%p1438_p0)
}
  0xad   : > { %p2201_p5 = scmp.ne.s32.totalorder %s2189_s24, 0  ;;  %p2202_p12 = scmp.ne.s32.totalorder %s2182_s27, 0 }
  0xae   : > { %s1918_s3 = sand.u32 (!%p2202_p12), 1, %s1576_s18   ;;  %p2203_p7 = scmp.ne.s32.totalorder (!%p2202_p12), %s2179_s25, 0 }
  0xaf   : > { %1214 = dma.hbm_to_vmem [thread:$0]  (!%p2201_p5), %s1871_s10, 64, %s448_s1, %s1804_s11  }
  0xb0   : > { %456 = sbr.rel (%p2202_p12) target bundleno = 598 (0x256), region = 56  ;;  %s1921_s21 = sshll.u32 (!%p2202_p12), %s1918_s3, 2 }
  0xb1   : > { %s459_s4 = scalar_lea.sflag (!%p2202_p12), [#allocation3], %s1918_s3  ;;  %s462_s9 = scalar_lea.vmem (!%p2202_p12), [#allocation2], %s1921_s21 }
  0xb7   : > { %1551 = dma.done.wait (%p2203_p7), %s459_s4, 64  }
  0xb8   : > { %1553 = vsyncadd (%p2203_p7), %s459_s4, 4294967232  ;;  %s467_s11 = sand.u32 1, %s1702_s23   ;;  %s471_s24 = scalar_lea.vmem [#allocation5], %s1921_s21 }
  0xb9   : > { %s468_s27 = scalar_lea.sflag [#allocation6], %s467_s11 }
  0xba   : > { %1555 = dma.done.wait (%p2203_p7), %s468_s27, 128  }
  0xbb   : > { %1557 = vsyncadd (%p2203_p7), %s468_s27, 4294967168  ;;  %s480_s10 = scalar_lea.vmem [#allocation7], %s1921_s21  ;;  %p2204_p13 = scmp.eq.s32.totalorder %s1702_s23, 0 }
  0xbd   : > { %1559 = dma.done.wait (%p2204_p13), [#allocation9], 512   ;;  %p2205_p9 = pmov %p2204_p13 }
  0xbe   : > { %v1601_v0 = vmov 0.0   ;;  %vm1602_vm0 = vmmov 0   ;;  %v1290_v1 = vld [vmem:[#allocation10] sm:$0xff]   ;;  %v1291_v2 = vld [vmem:[#allocation8] sm:$0xff]   ;;  %v1292_v3 = vld [vmem:[#allocation10 + $0x8] sm:$0xff]   ;;  %vm572_vm1 = vcmask 261120  }
  0xbf   : > { %1561 = vsyncadd (%p2205_p9), [#allocation9], 4294966784  ;;  %1162 = vmatprep.subr.bf16.mxu1 %v1601_v0  ;;  %1154 = vmatprep.subr.bf16.mxu0 %v1601_v0  ;;  %v1293_v4 = vld [vmem:[#allocation8 + $0x8] sm:$0xff]   ;;  %v637_v5 = vld [vmem:[%s471_s24] sm:$0xf]  ;;  %s1954_s14 = sshll.u32 %s1918_s3, 4 }
  0xc0   : > { %1166 = vmatprep.mubr.msk.bf16.mxu1 %vm1602_vm0, %v1601_v0  ;;  %1158 = vmatprep.mubr.msk.bf16.mxu0 %vm1602_vm0, %v1601_v0  ;;  %v548_v6 = vld [vmem:[%s462_s9] sm:$0xf]  ;;  %v1294_v7 = vld [vmem:[%s2139_s5] sm:$0xff]   ;;  %v1295_v8 = vld [vmem:[%s2139_s5 + $0x8] sm:$0xff]   ;;  %vm617_vm2 = vcmask 60416   ;;  %s1963_s12 = scalar_lea.vmem [#allocation12], %s1954_s14 }
  0xc1   : > { %1163 = vmatpush3.bf16.msra.mxu1 %v1290_v1  ;;  %1155 = vmatpush3.bf16.msra.mxu0 %v1291_v2  ;;  %v724_v9 = vld [vmem:[%s480_s10] sm:$0xf]  ;;  %s1603_s26 = smov 104   ;;  %s1604_s13 = smov 120  }
  0xc2   : > { %1164 = vmatprep.subr.bf16.mxu1 %v1601_v0  ;;  %1156 = vmatprep.subr.bf16.mxu0 %v1601_v0  ;;  %v1112_v10 = vld [vmem:[%s2141_s7] ss:$0 sm:$0xff]  ;;  %s1968_s21 = scalar_lea.vmem [#allocation11], %s1954_s14  ;;  %s1605_s27 = smov 112  }
  0xc3   : > { %v1104_v11 = vld [vmem:[%s2140_s6] ss:$0 sm:$0xff]  ;;  %s1976_s24 = scalar_lea.vmem [#allocation14], %s1954_s14  ;;  %s853_s10 = sshll.u32 %s1963_s12, 4  ;;  %s1984_s10 = int_to_ptr.vmem [resolvable:$true] %s853_s10 }
  0xc4   : > { %v1120_v24 = vld [vmem:[%s2142_s8] ss:$0 sm:$0xff]  ;;  %s1982_s25 = sshll.u32 %s1584_s20, 8  ;;  %s836_s1 = sshll.u32 %s1968_s21, 4  ;;  %s1997_s1 = int_to_ptr.vmem [resolvable:$true] %s836_s1 }
  0xc5   : > { %1165 = vmatpush3.bf16.msra.mxu1 %v1292_v3  ;;  %1157 = vmatpush3.bf16.msra.mxu0 %v1293_v4  ;;  %s2206_s14 = sld [smem:[#allocation30_spill]]  ;;  %s2005_s20 = scalar_lea.sflag [#allocation13], %s467_s11 }
  0xc6   : > { %1170 = vmatprep.subr.bf16.mxu0 %v1601_v0  ;;  %s1442_s17 = scalar_lea.vmem %s1984_s10, 256  ;;  %p2207_p4 = scmp.ne.s32.totalorder %s2187_s15, 0 }
  0xc7   : > { %p1443_p2 = scmp.ne.s32.totalorder %s1984_s10, %s1442_s17  ;;  %s1606_s28 = smov [#allocation12]  }
  0xc8   : > { %1167 = vmatmul.mubr.msk.bf16.vlgmr.msra.gmra.mrb[0].mxu1 %vm572_vm1, %v637_v5  ;;  %1159 = vmatmul.mubr.msk.bf16.vlgmr.msra.gmra.mrb[0].mxu0 %vm572_vm1, %v548_v6  ;;  %s1446_s29 = sshll.u32 %s1606_s28, 4  ;;  %s1447_s29 = int_to_ptr.vmem [resolvable:$false] %s1446_s29 }
  0xc9   : > { %1171 = vmatpush3.bf16.msra.mxu0 %v1294_v7  ;;  %1174 = vmatprep.mubr.msk.bf16.mxu0 %vm1602_vm0, %v1601_v0  ;;  %p1444_p1 = pnand %p1443_p2, %p2207_p4  ;;  %p1449_p11 = scmp.lt.s32.totalorder %s1984_s10, %s1447_s29 }
  0xca   : > { %1172 = vmatprep.subr.bf16.mxu0 %v1601_v0 }
  0xcb   : > { %s1995_s30 = scalar_lea.hbm %s2206_s14, %s1982_s25  ;;  %p1445_p3 = pneg %p1444_p1 }
  0xcd   : > { %1173 = vmatpush3.bf16.msra.mxu0 %v1295_v8 }
  0xd0   : > { %1175 = vmatmul.mubr.msk.bf16.vlgmr.msra.gmra.mrb[4].mxu0 %vm572_vm1, %v724_v9 }
 0x19b   : > { %v698_v12 = vpop.f32.mrb[0].mxu1  ;;  %v610_v14 = vpop.f32.mrb[0].mxu0 }
 0x19c   : > { %v699_v13 = vadd.f32 %v1112_v10, %v698_v12  ;;  %v1168_v15 = vpop.f32.mrb[1].mxu1  ;;  %v611_v16 = vadd.f32 %v1104_v11, %v610_v14  ;;  %v1160_v17 = vpop.f32.mrb[1].mxu0 }
 0x19d   : > { %v701_v18 = vpop.f32.mrb[2].mxu1  ;;  %v613_v20 = vpop.f32.mrb[2].mxu0 }
 0x19e   : > { %v704_v19 = vpack.c.bf16 %v699_v13, %v699_v13  ;;  %v1169_v21 = vpop.f32.mrb[3].mxu1  ;;  %v616_v22 = vpack.c.bf16 %v611_v16, %v611_v16  ;;  %v1161_v23 = vpop.f32.mrb[3].mxu0 }
 0x1a0   : > { %705 = vst.msk [vmem:[%s1963_s12] sm:$0xf] %vm617_vm2, %v704_v19  ;;  %719 = vrot.lane.b32.xlu1 %v704_v19, %s1603_s26  ;;  %709 = vrot.lane.b32.xlu0 %v704_v19, %s1604_s13  ;;  %618 = vst.msk [vmem:[%s1968_s21] sm:$0xf] %vm617_vm2, %v616_v22 }
 0x1a3   : > { %v785_v25 = vpop.f32.mrb[4].mxu0 }
 0x1a4   : > { %714 = vrot.lane.b32.xlu0 %v704_v19, %s1605_s27  ;;  %622 = vrot.lane.b32.xlu1 %v616_v22, %s1604_s13  ;;  %v786_v26 = vadd.f32 %v1120_v24, %v785_v25  ;;  %v1176_v27 = vpop.f32.mrb[5].mxu0 }
 0x1a5   : > { %v788_v28 = vpop.f32.mrb[6].mxu0 }
 0x1a6   : > { %v791_v29 = vpack.c.bf16 %v786_v26, %v786_v26  ;;  %v1177_v30 = vpop.f32.mrb[7].mxu0 }
 0x1a8   : > { %627 = vrot.lane.b32.xlu0 %v616_v22, %s1605_s27  ;;  %632 = vrot.lane.b32.xlu1 %v616_v22, %s1603_s26  ;;  %792 = vst.msk [vmem:[%s1976_s24] sm:$0xf] %vm617_vm2, %v791_v29 }
 0x1ac   : > { %801 = vrot.lane.b32.xlu1 %v791_v29, %s1605_s27  ;;  %796 = vrot.lane.b32.xlu0 %v791_v29, %s1604_s13 }
 0x1b0   : > { %806 = vrot.lane.b32.xlu0 %v791_v29, %s1603_s26  ;;  %s1448_s26 = scalar_lea.vmem %s1447_s29, 512 }
 0x1b1   : > { %p1450_p10 = scmp.lt.s32.totalorder %s1448_s26, %s1442_s17 }
 0x1b3   : > { %p1451_p6 = por %p1450_p10, %p1449_p11 }
 0x1b5   : > { %p1452_p8 = pnand %p1451_p6, %p1445_p3 }
 0x212   : > { %v720_v31 = vpop.permute.xlu1 %719  ;;  %v710_v32 = vpop.permute.xlu0 %709 }
 0x213   : > { %1119 = vst.msk [vmem:[%s1963_s12 + $0xc] sm:$0xf] %vm617_vm2, %v720_v31  ;;  %1117 = vst.msk [vmem:[%s1963_s12 + $0x4] sm:$0xf] %vm617_vm2, %v710_v32 }
 0x216   : > { %v715_v33 = vpop.permute.xlu0 %714  ;;  %v623_v34 = vpop.permute.xlu1 %622 }
 0x217   : > { %1118 = vst.msk [vmem:[%s1963_s12 + $0x8] sm:$0xf] %vm617_vm2, %v715_v33  ;;  %1109 = vst.msk [vmem:[%s1968_s21 + $0x4] sm:$0xf] %vm617_vm2, %v623_v34 }
 0x218   : > { %1455 = shalt.err (!%p1452_p8)
}
 0x219   : > { %s1456_s23 = scalar_lea.hbm %s1995_s30, 256  ;;  %s1460_s13 = scalar_lea.hbm %s2206_s14, 512 }
 0x21a   : > { %p1457_p0 = scmp.ne.s32.totalorder %s1995_s30, %s1456_s23  ;;  %p1461_p7 = scmp.lt.u32.totalorder %s1995_s30, %s2206_s14 }
 0x21b   : > { %p1462_p13 = scmp.lt.u32.totalorder %s1460_s13, %s1456_s23  ;;  %p1464_p2 = scmp.lt.u32.totalorder %s1456_s23, %s1995_s30 }
 0x21c   : > { %p1458_p5 = pnand %p1457_p0, %p2207_p4 }
 0x21d   : > { %p1463_p9 = por %p1462_p13, %p1461_p7 }
 0x21e   : > { %p1459_p12 = pneg %p1458_p5 }
 0x21f   : > { %p1465_p1 = por %p1464_p2, %p1463_p9 }
 0x221   : > { %p1466_p3 = pnand %p1465_p1, %p1459_p12 }
 0x223   : > { %1469 = shalt.err (!%p1466_p3)
}
 0x224   : > { %s1607_s27 = smov 64   ;;  %s1608_s16 = smov 4   ;;  %v628_v35 = vpop.permute.xlu0 %627  ;;  %v633_v36 = vpop.permute.xlu1 %632 }
 0x225   : > { %1193 = dma.vmem_to_hbm [thread:$0]  (%p2207_p4), %s1984_s10, 256, %s1995_s30, %s2005_s20, %s1607_s27, %s1607_s27, %s1608_s16  }
 0x226   : > { %s2208_s28 = sld [smem:[#allocation29_spill]]  ;;  %1110 = vst.msk [vmem:[%s1968_s21 + $0x8] sm:$0xf] %vm617_vm2, %v628_v35  ;;  %1111 = vst.msk [vmem:[%s1968_s21 + $0xc] sm:$0xf] %vm617_vm2, %v633_v36  ;;  %s812_s26 = scalar_lea.sflag [#allocation4], %s1918_s3 }
 0x227   : > { %s1470_s23 = scalar_lea.vmem %s1997_s1, 256  ;;  %s1609_s11 = smov [#allocation11]  }
 0x228   : > { %p1471_p11 = scmp.ne.s32.totalorder %s1997_s1, %s1470_s23  ;;  %s1474_s12 = sshll.u32 %s1609_s11, 4  ;;  %s1475_s12 = int_to_ptr.vmem [resolvable:$false] %s1474_s12 }
 0x229   : > { %s1476_s10 = scalar_lea.vmem %s1475_s12, 512  ;;  %p1477_p8 = scmp.lt.s32.totalorder %s1997_s1, %s1475_s12 }
 0x22a   : > { %p1472_p10 = pnand %p1471_p11, %p2207_p4  ;;  %p1478_p0 = scmp.lt.s32.totalorder %s1476_s10, %s1470_s23 }
 0x22c   : > { %s2036_s29 = scalar_lea.hbm %s2208_s28, %s1982_s25  ;;  %p1473_p6 = pneg %p1472_p10 }
 0x22d   : > { %p1479_p5 = por %p1478_p0, %p1477_p8 }
 0x22f   : > { %p1480_p12 = pnand %p1479_p5, %p1473_p6 }
 0x231   : > { %1483 = shalt.err (!%p1480_p12)
}
 0x232   : > { %s1484_s21 = scalar_lea.hbm %s2036_s29, 256  ;;  %s1488_s4 = scalar_lea.hbm %s2208_s28, 512 }
 0x233   : > { %p1485_p7 = scmp.ne.s32.totalorder %s2036_s29, %s1484_s21  ;;  %p1489_p2 = scmp.lt.u32.totalorder %s2036_s29, %s2208_s28 }
 0x234   : > { %p1490_p1 = scmp.lt.u32.totalorder %s1488_s4, %s1484_s21  ;;  %p1492_p11 = scmp.lt.u32.totalorder %s1484_s21, %s2036_s29 }
 0x235   : > { %p1486_p13 = pnand %p1485_p7, %p2207_p4 }
 0x236   : > { %p1491_p3 = por %p1490_p1, %p1489_p2 }
 0x237   : > { %p1487_p9 = pneg %p1486_p13 }
 0x238   : > { %p1493_p10 = por %p1492_p11, %p1491_p3 }
 0x23a   : > { %p1494_p6 = pnand %p1493_p10, %p1487_p9 }
 0x23c   : > { %1497 = shalt.err (!%p1494_p6)
}
 0x23d   : > { %1192 = dma.vmem_to_hbm [thread:$0]  (%p2207_p4), %s1997_s1, 256, %s2036_s29, %s812_s26, %s1607_s27, %s1607_s27, %s1608_s16   ;;  %v802_v37 = vpop.permute.xlu1 %801  ;;  %v797_v38 = vpop.permute.xlu0 %796 }
 0x23e   : > { %s870_s17 = sshll.u32 %s1976_s24, 4  ;;  %1126 = vst.msk [vmem:[%s1976_s24 + $0x8] sm:$0xf] %vm617_vm2, %v802_v37  ;;  %1125 = vst.msk [vmem:[%s1976_s24 + $0x4] sm:$0xf] %vm617_vm2, %v797_v38  ;;  %s2209_s11 = sld [smem:[#allocation31_spill]]  ;;  %s2074_s17 = int_to_ptr.vmem [resolvable:$true] %s870_s17 }
 0x23f   : > { %s1498_s1 = scalar_lea.vmem %s2074_s17, 256  ;;  %s1610_s29 = smov [#allocation14]  }
 0x240   : > { %p1499_p8 = scmp.ne.s32.totalorder %s2074_s17, %s1498_s1  ;;  %s1502_s26 = sshll.u32 %s1610_s29, 4  ;;  %s1503_s26 = int_to_ptr.vmem [resolvable:$false] %s1502_s26 }
 0x241   : > { %v807_v39 = vpop.permute.xlu0 %806  ;;  %s1504_s10 = scalar_lea.vmem %s1503_s26, 512  ;;  %p1505_p12 = scmp.lt.s32.totalorder %s2074_s17, %s1503_s26 }
 0x242   : > { %1127 = vst.msk [vmem:[%s1976_s24 + $0xc] sm:$0xf] %vm617_vm2, %v807_v39  ;;  %p1500_p0 = pnand %p1499_p8, %p2207_p4  ;;  %p1506_p7 = scmp.lt.s32.totalorder %s1504_s10, %s1498_s1 }
 0x244   : > { %s2080_s12 = scalar_lea.hbm %s2209_s11, %s1982_s25  ;;  %p1501_p5 = pneg %p1500_p0 }
 0x245   : > { %p1507_p13 = por %p1506_p7, %p1505_p12 }
 0x247   : > { %p1508_p9 = pnand %p1507_p13, %p1501_p5 }
 0x249   : > { %1511 = shalt.err (!%p1508_p9)
}
 0x24a   : > { %s1512_s24 = scalar_lea.hbm %s2080_s12, 256  ;;  %s1516_s30 = scalar_lea.hbm %s2209_s11, 512 }
 0x24b   : > { %p1513_p2 = scmp.ne.s32.totalorder %s2080_s12, %s1512_s24  ;;  %p1517_p11 = scmp.lt.u32.totalorder %s2080_s12, %s2209_s11 }
 0x24c   : > { %p1518_p10 = scmp.lt.u32.totalorder %s1516_s30, %s1512_s24  ;;  %p1520_p8 = scmp.lt.u32.totalorder %s1512_s24, %s2080_s12 }
 0x24d   : > { %p1514_p1 = pnand %p1513_p2, %p2207_p4 }
 0x24e   : > { %p1519_p6 = por %p1518_p10, %p1517_p11 }
 0x24f   : > { %p1515_p3 = pneg %p1514_p1 }
 0x250   : > { %p1521_p0 = por %p1520_p8, %p1519_p6 }
 0x252   : > { %p1522_p5 = pnand %p1521_p0, %p1515_p3 }
 0x254   : > { %1525 = shalt.err (!%p1522_p5)
}
 0x255   : > { %1194 = dma.vmem_to_hbm [thread:$0]  (%p2207_p4), %s2074_s17, 256, %s2080_s12, %s2005_s20, %s1607_s27, %s1607_s27, %s1608_s16  }
 0x256 PF: > { %s2210_s9 = sld [smem:[#allocation20_spill]]  ;;  %s2211_s22 = sld [smem:[#allocation23_spill]] }
 0x257   : > { %s2212_s23 = sld [smem:[#allocation22_spill]] }
 0x25c   : > { %s885_s3 = sand.u32 1, %s2210_s9   ;;  %p2213_p12 = scmp.ne.s32.totalorder %s2211_s22, 0 }
 0x25d   : > { %p2214_p7 = scmp.ge.s32.totalorder %s2212_s23, 2  ;;  %s886_s1 = scalar_lea.sflag [#allocation4], %s885_s3 }
 0x25f   : > { %p1216_p13 = pnand %p2214_p7, %p2213_p12 }
 0x261   : > { %1563 = dma.done.wait (!%p1216_p13), %s886_s1, 256  }
 0x262   : > { %1565 = vsyncadd (!%p1216_p13), %s886_s1, 4294967040  ;;  %s2215_s15 = sadd.s32 4294967294, %s2212_s23  }
 0x263   : > { %s894_s29 = sand.u32 1, %s2215_s15  }
 0x264   : > { %s895_s26 = scalar_lea.sflag [#allocation13], %s894_s29 }
 0x265   : > { %1567 = dma.done.wait (!%p1216_p13), %s895_s26, 512  }
 0x266   : > { %1569 = vsyncadd (!%p1216_p13), %s895_s26, 4294966784  ;;  %s35_s22 = sadd.s32 1, %s2212_s23   ;;  %s2216_s20 = sld [smem:[#allocation25_spill]] }
 0x267   : > { %p32_p4 = scmp.ge.s32.totalorder %s35_s22, 4   ;;  %s2217_s27 = sld [smem:[#allocation21_spill]] }
 0x268   : > { %s2218_s21 = sld [smem:[#allocation24_spill]]  ;;  %s2219_s17 = smov %s1576_s18 }
 0x269   : > { %s2220_s18 = smov %s1580_s19  ;;  %34 = sbr.rel (!%p32_p4) target bundleno = 18 (0x12), region = 174 }
 0x26c   : > { %s2221_s19 = smov %s2216_s20 }
 0x26d   : > { %s2222_s20 = smov %s2217_s27 }
 0x270   :  { %909 = vsyncpa [#allocation3], 1 }
 0x271   :  { %911 = vsyncpa [#allocation3 + $0x1], 1 }
 0x272   :  { %912 = vsyncpa [#allocation6], 1 }
 0x273   :  { %914 = vsyncpa [#allocation6 + $0x1], 1 }
 0x274   :  { %915 = vsyncpa [#allocation9], 1 }
 0x275   :  { %916 = vsyncpa [#allocation4], 1 }
 0x276   :  { %918 = vsyncpa [#allocation4 + $0x1], 1 }
 0x277   :  { %919 = vsyncpa [#allocation13], 1 }
 0x278   :  { %921 = vsyncpa [#allocation13 + $0x1], 1 }

</bundles_post_ra>
